<compile_context>
chip_gen: v6e
topology: v6e:2x2x1
jax: 0.10.0
libtpu: 0.0.40
codegen_flags: <defaults>
</compile_context>

<pallas_src>
import functools

import jax
import jax.numpy as jnp
from jax.experimental import pallas as pl
from jax.experimental.pallas import tpu as pltpu

ANCHOR_NUM = 2               # default of _make_*_head
OUT_CHANNEL = 64             # cfg['out_channel'] (mobilenet0.25 config)
BBOX_C = ANCHOR_NUM * 4      # 8
CLS_C = ANCHOR_NUM * 2       # 4
LDM_C = ANCHOR_NUM * 10      # 20
FUSED_C = BBOX_C + CLS_C + LDM_C   # 32, column order [bbox(8)|cls(4)|ldm(20)]
NUM_LEVELS = 3


# ----------------------------- Pallas kernel ------------------------------ #
def _heads_kernel(f1_ref, f2_ref, f3_ref, wT_ref, b_ref,
                  o1_ref, o2_ref, o3_ref):
    """One grid step = one batch element; all 3 FPN levels computed here.

    f*_ref : (C, HW_l)   f32   NCHW feature slice for this batch element
    wT_ref : (3, 32, C)  bf16  fused [bbox|cls|ldm] 1x1-conv weights (transposed)
    b_ref  : (3, 32, 1)  f32   fused biases
    o*_ref : (32, HW_l)  f32   transposed head output (lane-dense on HW)
    """
    for lvl, (f_ref, o_ref) in enumerate(
            ((f1_ref, o1_ref), (f2_ref, o2_ref), (f3_ref, o3_ref))):
        x = f_ref[...].astype(jnp.bfloat16)                       # (C, HW)
        wt = wT_ref[lvl]                                          # (32, C) bf16
        acc = jnp.dot(wt, x, preferred_element_type=jnp.float32)  # (32, HW) f32
        o_ref[...] = acc + b_ref[lvl]                             # (32,1) b-cast


# ------------------------------ head module ------------------------------- #
def init_head_params(key, num_levels=NUM_LEVELS, inchannels=OUT_CHANNEL):
    """Deterministic synthetic weights: per level a fused (C, 32) weight and
    a (32,) bias, column order [bbox(8) | class(4) | landmark(20)].

    NOTE: when porting real PyTorch head weights, the per-anchor channel
    ordering inside each group must match PyTorch's conv output channels so
    that the .reshape(N, -1, k) interleaves anchors per spatial location.
    """
    params = []
    for _ in range(num_levels):
        key, k_w, k_b = jax.random.split(key, 3)
        scale = 1.0 / jnp.sqrt(jnp.float32(inchannels))
        w = jax.random.normal(k_w, (inchannels, FUSED_C), jnp.float32) * scale
        b = jax.random.normal(k_b, (FUSED_C,), jnp.float32) * 0.01
        params.append((w, b))
    return params


def pack_head_params(params):
    """Stack the per-level params for the kernel: (3,32,C) bf16, (3,32,1) f32."""
    wT = jnp.stack([w.T for (w, _) in params]).astype(jnp.bfloat16)
    b = jnp.stack([b for (_, b) in params]).reshape(NUM_LEVELS, FUSED_C, 1)
    return wT, b


@functools.partial(jax.jit, static_argnames=("phase",))
def retinaface_heads_forward(features_nchw, wT, b, phase="train"):
    """Head stage of RetinaFace.forward.

    features_nchw: tuple of 3 arrays, each (N, C, H_l, W_l)  (SSH outputs)
    wT, b        : packed head params from pack_head_params
    Returns (bbox_regressions, classifications, ldm_regressions).
    """
    f1, f2, f3 = features_nchw
    N, C = f1.shape[0], f1.shape[1]
    hw = tuple(int(f.shape[2] * f.shape[3]) for f in (f1, f2, f3))

    # NCHW -> (N, C, H*W): pure reshape of contiguous memory, no transpose.
    f1r = f1.reshape(N, C, hw[0])
    f2r = f2.reshape(N, C, hw[1])
    f3r = f3.reshape(N, C, hw[2])

    flops = 2 * N * C * FUSED_C * sum(hw)
    bytes_accessed = (4 * N * C * sum(hw)            # features (f32)
                      + 2 * wT.size + 4 * b.size     # params
                      + 4 * N * FUSED_C * sum(hw))   # outputs (f32)

    outs = pl.pallas_call(
        _heads_kernel,
        out_shape=tuple(
            jax.ShapeDtypeStruct((N, FUSED_C, m), jnp.float32) for m in hw),
        grid_spec=pltpu.PrefetchScalarGridSpec(
            num_scalar_prefetch=0,
            grid=(N,),   # batch axis; >=2 "parallel" blocks -> both TCs on v7x
            in_specs=[
                pl.BlockSpec((None, C, hw[0]), lambda n: (n, 0, 0)),
                pl.BlockSpec((None, C, hw[1]), lambda n: (n, 0, 0)),
                pl.BlockSpec((None, C, hw[2]), lambda n: (n, 0, 0)),
                pl.BlockSpec((NUM_LEVELS, FUSED_C, C), lambda n: (0, 0, 0)),
                pl.BlockSpec((NUM_LEVELS, FUSED_C, 1), lambda n: (0, 0, 0)),
            ],
            out_specs=[
                pl.BlockSpec((None, FUSED_C, hw[0]), lambda n: (n, 0, 0)),
                pl.BlockSpec((None, FUSED_C, hw[1]), lambda n: (n, 0, 0)),
                pl.BlockSpec((None, FUSED_C, hw[2]), lambda n: (n, 0, 0)),
            ],
        ),
        compiler_params=pltpu.CompilerParams(
            dimension_semantics=("parallel",)),
        cost_estimate=pl.CostEstimate(
            flops=flops, transcendentals=0, bytes_accessed=bytes_accessed),
    )(f1r, f2r, f3r, wT, b)

    bbox_parts, cls_parts, ldm_parts = [], [], []
    for out_t, m in zip(outs, hw):
        # Tiny output-side fix-up: (N, 32, HW) -> (N, HW, 32) in the wrapper.
        out = jnp.transpose(out_t, (0, 2, 1))
        bbox_parts.append(out[:, :, :BBOX_C].reshape(N, m * ANCHOR_NUM, 4))
        cls_parts.append(
            out[:, :, BBOX_C:BBOX_C + CLS_C].reshape(N, m * ANCHOR_NUM, 2))
        ldm_parts.append(
            out[:, :, BBOX_C + CLS_C:].reshape(N, m * ANCHOR_NUM, 10))

    bbox_regressions = jnp.concatenate(bbox_parts, axis=1)
    classifications = jnp.concatenate(cls_parts, axis=1)
    ldm_regressions = jnp.concatenate(ldm_parts, axis=1)

    if phase == "train":
        return bbox_regressions, classifications, ldm_regressions
    # test phase: F.softmax(classifications, dim=-1) -- glue-level op in XLA
    return (bbox_regressions,
            jax.nn.softmax(classifications, axis=-1),
            ldm_regressions)


# ------------------------------- references ------------------------------- #
def _reference(features_nchw, params, cast_bf16=False):
    bbox_parts, cls_parts, ldm_parts = [], [], []
    for (x, (w, bias)) in zip(features_nchw, params):
        N, C, H, W = x.shape
        x_flat = jnp.transpose(x, (0, 2, 3, 1)).reshape(N * H * W, C)
        if cast_bf16:
            out = jnp.dot(x_flat.astype(jnp.bfloat16), w.astype(jnp.bfloat16),
                          preferred_element_type=jnp.float32) + bias
        else:
            out = x_flat @ w + bias
        bbox_parts.append(out[:, :BBOX_C].reshape(N, H * W * ANCHOR_NUM, 4))
        cls_parts.append(
            out[:, BBOX_C:BBOX_C + CLS_C].reshape(N, H * W * ANCHOR_NUM, 2))
        ldm_parts.append(
            out[:, BBOX_C + CLS_C:].reshape(N, H * W * ANCHOR_NUM, 10))
    return (jnp.concatenate(bbox_parts, axis=1),
            jnp.concatenate(cls_parts, axis=1),
            jnp.concatenate(ldm_parts, axis=1))


# --------------------------------- main ------------------------------------ #
if __name__ == "__main__":
    # TODO(synk): backbone (MobileNetV1/ResNet50), FPN and SSH definitions are
    # not provided in the module; the three SSH feature maps are synthesized
    # directly and fed to the (Pallas) head stage.
    key = jax.random.PRNGKey(0)
    k_f1, k_f2, k_f3, k_p = jax.random.split(key, 4)

    N = 2
    features = (
        jax.random.normal(k_f1, (N, OUT_CHANNEL, 16, 16), jnp.float32),
        jax.random.normal(k_f2, (N, OUT_CHANNEL, 8, 8), jnp.float32),
        jax.random.normal(k_f3, (N, OUT_CHANNEL, 4, 4), jnp.float32),
    )
    params = init_head_params(k_p)
    wT, b = pack_head_params(params)

    bbox, cls, ldm = retinaface_heads_forward(features, wT, b, phase="train")
    jax.block_until_ready((bbox, cls, ldm))

    num_priors = sum(f.shape[2] * f.shape[3] * ANCHOR_NUM for f in features)
    assert bbox.shape == (N, num_priors, 4), bbox.shape
    assert cls.shape == (N, num_priors, 2), cls.shape
    assert ldm.shape == (N, num_priors, 10), ldm.shape

    # Tight check against a bf16-operand reference (same numerics as kernel).
    rb16, rc16, rl16 = _reference(features, params, cast_bf16=True)
    assert jnp.allclose(bbox, rb16, atol=1e-4, rtol=1e-4)
    assert jnp.allclose(cls, rc16, atol=1e-4, rtol=1e-4)
    assert jnp.allclose(ldm, rl16, atol=1e-4, rtol=1e-4)

    # Looser check against the full-f32 reference (bf16 input rounding, K=64).
    rb32, rc32, rl32 = _reference(features, params, cast_bf16=False)
    assert jnp.allclose(bbox, rb32, atol=5e-2, rtol=5e-2)
    assert jnp.allclose(cls, rc32, atol=5e-2, rtol=5e-2)
    assert jnp.allclose(ldm, rl32, atol=5e-2, rtol=5e-2)

    print("KERNEL_OK")
</pallas_src>

<mosaic_0001>
module attributes {stable_mosaic.version = 11 : i64} {
  func.func @_heads_kernel(%arg0: i32, %arg1: memref<1x64x256xf32, #tpu.memory_space<vmem>>, %arg2: memref<1x64x64xf32, #tpu.memory_space<vmem>>, %arg3: memref<1x64x16xf32, #tpu.memory_space<vmem>>, %arg4: memref<3x32x64xbf16, #tpu.memory_space<vmem>>, %arg5: memref<3x32x1xf32, #tpu.memory_space<vmem>>, %arg6: memref<1x32x256xf32, #tpu.memory_space<vmem>>, %arg7: memref<1x32x64xf32, #tpu.memory_space<vmem>>, %arg8: memref<1x32x16xf32, #tpu.memory_space<vmem>>) attributes {dimension_semantics = [#tpu.dimension_semantics<parallel>], iteration_bounds = array<i64: 2>, scalar_prefetch = 0 : i64, scratch_operands = 0 : i64, tpu.core_type = #tpu.core_type<tc>, window_params = [{transform_indices = @transform_0, window_bounds = array<i64: 1, 64, 256>}, {transform_indices = @transform_1, window_bounds = array<i64: 1, 64, 64>}, {transform_indices = @transform_2, window_bounds = array<i64: 1, 64, 16>}, {pipeline_mode = #tpu.pipeline_mode<synchronous>, transform_indices = @transform_3, window_bounds = array<i64: 3, 32, 64>}, {pipeline_mode = #tpu.pipeline_mode<synchronous>, transform_indices = @transform_4, window_bounds = array<i64: 3, 32, 1>}, {transform_indices = @transform_5, window_bounds = array<i64: 1, 32, 256>}, {transform_indices = @transform_6, window_bounds = array<i64: 1, 32, 64>}, {transform_indices = @transform_7, window_bounds = array<i64: 1, 32, 16>}]} {
    %c0 = arith.constant 0 : index
    %c0_0 = arith.constant 0 : index
    %c0_1 = arith.constant 0 : index
    %0 = vector.load %arg1[%c0, %c0_0, %c0_1] : memref<1x64x256xf32, #tpu.memory_space<vmem>>, vector<1x64x256xf32>
    %1 = vector.shape_cast %0 : vector<1x64x256xf32> to vector<64x256xf32>
    %2 = arith.truncf %1 : vector<64x256xf32> to vector<64x256xbf16>
    %c0_2 = arith.constant 0 : index
    %c0_3 = arith.constant 0 : index
    %c0_4 = arith.constant 0 : index
    %3 = vector.load %arg4[%c0_2, %c0_3, %c0_4] : memref<3x32x64xbf16, #tpu.memory_space<vmem>>, vector<1x32x64xbf16>
    %4 = vector.shape_cast %3 : vector<1x32x64xbf16> to vector<32x64xbf16>
    %cst = arith.constant dense<0.000000e+00> : vector<32x256xf32>
    %5 = tpu.matmul %4, %2, %cst {dimension_numbers = #tpu.dot_dimension_numbers<[1], [0], [0], [1], [0, 0, 1, 1], [], []>} : vector<32x64xbf16>, vector<64x256xbf16>, vector<32x256xf32> -> vector<32x256xf32>
    %c0_5 = arith.constant 0 : index
    %c0_6 = arith.constant 0 : index
    %c0_7 = arith.constant 0 : index
    %6 = vector.load %arg5[%c0_5, %c0_6, %c0_7] : memref<3x32x1xf32, #tpu.memory_space<vmem>>, vector<1x32x1xf32>
    %7 = vector.shape_cast %6 : vector<1x32x1xf32> to vector<32x1xf32>
    %8 = vector.broadcast %7 : vector<32x1xf32> to vector<32x256xf32>
    %9 = arith.addf %5, %8 : vector<32x256xf32>
    %c0_8 = arith.constant 0 : index
    %c0_9 = arith.constant 0 : index
    %c0_10 = arith.constant 0 : index
    %10 = vector.load %arg6[%c0_8, %c0_9, %c0_10] : memref<1x32x256xf32, #tpu.memory_space<vmem>>, vector<1x32x256xf32>
    %11 = vector.shape_cast %10 : vector<1x32x256xf32> to vector<32x256xf32>
    %12 = vector.shape_cast %9 : vector<32x256xf32> to vector<1x32x256xf32>
    tpu.vector_store %arg6[%c0_8, %c0_9, %c0_10], %12 {strides = array<i32>} : memref<1x32x256xf32, #tpu.memory_space<vmem>>, vector<1x32x256xf32>,
    %c0_11 = arith.constant 0 : index
    %c0_12 = arith.constant 0 : index
    %c0_13 = arith.constant 0 : index
    %13 = vector.load %arg2[%c0_11, %c0_12, %c0_13] : memref<1x64x64xf32, #tpu.memory_space<vmem>>, vector<1x64x64xf32>
    %14 = vector.shape_cast %13 : vector<1x64x64xf32> to vector<64x64xf32>
    %15 = arith.truncf %14 : vector<64x64xf32> to vector<64x64xbf16>
    %c1 = arith.constant 1 : index
    %c0_14 = arith.constant 0 : index
    %c0_15 = arith.constant 0 : index
    %16 = vector.load %arg4[%c1, %c0_14, %c0_15] : memref<3x32x64xbf16, #tpu.memory_space<vmem>>, vector<1x32x64xbf16>
    %17 = vector.shape_cast %16 : vector<1x32x64xbf16> to vector<32x64xbf16>
    %cst_16 = arith.constant dense<0.000000e+00> : vector<32x64xf32>
    %18 = tpu.matmul %17, %15, %cst_16 {dimension_numbers = #tpu.dot_dimension_numbers<[1], [0], [0], [1], [0, 0, 1, 1], [], []>} : vector<32x64xbf16>, vector<64x64xbf16>, vector<32x64xf32> -> vector<32x64xf32>
    %c1_17 = arith.constant 1 : index
    %c0_18 = arith.constant 0 : index
    %c0_19 = arith.constant 0 : index
    %19 = vector.load %arg5[%c1_17, %c0_18, %c0_19] : memref<3x32x1xf32, #tpu.memory_space<vmem>>, vector<1x32x1xf32>
    %20 = vector.shape_cast %19 : vector<1x32x1xf32> to vector<32x1xf32>
    %21 = vector.broadcast %20 : vector<32x1xf32> to vector<32x64xf32>
    %22 = arith.addf %18, %21 : vector<32x64xf32>
    %c0_20 = arith.constant 0 : index
    %c0_21 = arith.constant 0 : index
    %c0_22 = arith.constant 0 : index
    %23 = vector.load %arg7[%c0_20, %c0_21, %c0_22] : memref<1x32x64xf32, #tpu.memory_space<vmem>>, vector<1x32x64xf32>
    %24 = vector.shape_cast %23 : vector<1x32x64xf32> to vector<32x64xf32>
    %25 = vector.shape_cast %22 : vector<32x64xf32> to vector<1x32x64xf32>
    tpu.vector_store %arg7[%c0_20, %c0_21, %c0_22], %25 {strides = array<i32>} : memref<1x32x64xf32, #tpu.memory_space<vmem>>, vector<1x32x64xf32>,
    %c0_23 = arith.constant 0 : index
    %c0_24 = arith.constant 0 : index
    %c0_25 = arith.constant 0 : index
    %26 = vector.load %arg3[%c0_23, %c0_24, %c0_25] : memref<1x64x16xf32, #tpu.memory_space<vmem>>, vector<1x64x16xf32>
    %27 = vector.shape_cast %26 : vector<1x64x16xf32> to vector<64x16xf32>
    %28 = arith.truncf %27 : vector<64x16xf32> to vector<64x16xbf16>
    %c2 = arith.constant 2 : index
    %c0_26 = arith.constant 0 : index
    %c0_27 = arith.constant 0 : index
    %29 = vector.load %arg4[%c2, %c0_26, %c0_27] : memref<3x32x64xbf16, #tpu.memory_space<vmem>>, vector<1x32x64xbf16>
    %30 = vector.shape_cast %29 : vector<1x32x64xbf16> to vector<32x64xbf16>
    %cst_28 = arith.constant dense<0.000000e+00> : vector<32x16xf32>
    %31 = tpu.matmul %30, %28, %cst_28 {dimension_numbers = #tpu.dot_dimension_numbers<[1], [0], [0], [1], [0, 0, 1, 1], [], []>} : vector<32x64xbf16>, vector<64x16xbf16>, vector<32x16xf32> -> vector<32x16xf32>
    %c2_29 = arith.constant 2 : index
    %c0_30 = arith.constant 0 : index
    %c0_31 = arith.constant 0 : index
    %32 = vector.load %arg5[%c2_29, %c0_30, %c0_31] : memref<3x32x1xf32, #tpu.memory_space<vmem>>, vector<1x32x1xf32>
    %33 = vector.shape_cast %32 : vector<1x32x1xf32> to vector<32x1xf32>
    %34 = vector.broadcast %33 : vector<32x1xf32> to vector<32x16xf32>
    %35 = arith.addf %31, %34 : vector<32x16xf32>
    %c0_32 = arith.constant 0 : index
    %c0_33 = arith.constant 0 : index
    %c0_34 = arith.constant 0 : index
    %36 = vector.load %arg8[%c0_32, %c0_33, %c0_34] : memref<1x32x16xf32, #tpu.memory_space<vmem>>, vector<1x32x16xf32>
    %37 = vector.shape_cast %36 : vector<1x32x16xf32> to vector<32x16xf32>
    %38 = vector.shape_cast %35 : vector<32x16xf32> to vector<1x32x16xf32>
    tpu.vector_store %arg8[%c0_32, %c0_33, %c0_34], %38 {strides = array<i32>} : memref<1x32x16xf32, #tpu.memory_space<vmem>>, vector<1x32x16xf32>,
    return
  }
  func.func @transform_0(%arg0: i32) -> (i32, i32, i32) {
    %c0_i32 = arith.constant 0 : i32
    %c0_i32_0 = arith.constant 0 : i32
    %c0_i32_1 = arith.constant 0 : i32
    return %arg0, %c0_i32, %c0_i32_0 : i32, i32, i32
  }
  func.func @transform_1(%arg0: i32) -> (i32, i32, i32) {
    %c0_i32 = arith.constant 0 : i32
    %c0_i32_0 = arith.constant 0 : i32
    %c0_i32_1 = arith.constant 0 : i32
    return %arg0, %c0_i32, %c0_i32_0 : i32, i32, i32
  }
  func.func @transform_2(%arg0: i32) -> (i32, i32, i32) {
    %c0_i32 = arith.constant 0 : i32
    %c0_i32_0 = arith.constant 0 : i32
    %c0_i32_1 = arith.constant 0 : i32
    return %arg0, %c0_i32, %c0_i32_0 : i32, i32, i32
  }
  func.func @transform_3(%arg0: i32) -> (i32, i32, i32) {
    %c0_i32 = arith.constant 0 : i32
    %c0_i32_0 = arith.constant 0 : i32
    %c0_i32_1 = arith.constant 0 : i32
    %c0_i32_2 = arith.constant 0 : i32
    return %c0_i32, %c0_i32_0, %c0_i32_1 : i32, i32, i32
  }
  func.func @transform_4(%arg0: i32) -> (i32, i32, i32) {
    %c0_i32 = arith.constant 0 : i32
    %c0_i32_0 = arith.constant 0 : i32
    %c0_i32_1 = arith.constant 0 : i32
    %c0_i32_2 = arith.constant 0 : i32
    return %c0_i32, %c0_i32_0, %c0_i32_1 : i32, i32, i32
  }
  func.func @transform_5(%arg0: i32) -> (i32, i32, i32) {
    %c0_i32 = arith.constant 0 : i32
    %c0_i32_0 = arith.constant 0 : i32
    %c0_i32_1 = arith.constant 0 : i32
    return %arg0, %c0_i32, %c0_i32_0 : i32, i32, i32
  }
  func.func @transform_6(%arg0: i32) -> (i32, i32, i32) {
    %c0_i32 = arith.constant 0 : i32
    %c0_i32_0 = arith.constant 0 : i32
    %c0_i32_1 = arith.constant 0 : i32
    return %arg0, %c0_i32, %c0_i32_0 : i32, i32, i32
  }
  func.func @transform_7(%arg0: i32) -> (i32, i32, i32) {
    %c0_i32 = arith.constant 0 : i32
    %c0_i32_0 = arith.constant 0 : i32
    %c0_i32_1 = arith.constant 0 : i32
    return %arg0, %c0_i32, %c0_i32_0 : i32, i32, i32
  }
}

</mosaic_0001>

<bundles_post_ra>
// kernel: retinaface_heads_forward.1
= control target key start
LH: loop header
LB: loop body
LE: loop exit
PB: predicated region body
PF: predicated region fallthrough
CT: control target
= control target key end

     0   :  { %s998_s24 = smov 0   ;;  %s1157_s0 = inlined_call_operand.vmem [shape: f32[2,64,256], index: 0, kind: input, shape index: {}]   ;;  %s1158_s1 = inlined_call_operand.vmem [shape: f32[2,64,64], index: 1, kind: input, shape index: {}]   ;;  %s1159_s2 = inlined_call_operand.vmem [shape: f32[2,64,16], index: 2, kind: input, shape index: {}]   ;;  %s1160_s3 = inlined_call_operand.vmem [shape: bf16[3,32,64], index: 3, kind: input, shape index: {}]   ;;  %s1161_s4 = inlined_call_operand.vmem [shape: f32[3,32,1], index: 4, kind: input, shape index: {}]   ;;  %s1162_s5 = inlined_call_operand.vmem [shape: f32[2,32,256], index: 5, kind: output, shape index: {0}]   ;;  %s1163_s6 = inlined_call_operand.vmem [shape: f32[2,32,64], index: 6, kind: output, shape index: {1}]   ;;  %s1164_s7 = inlined_call_operand.vmem [shape: f32[2,32,16], index: 7, kind: output, shape index: {2}]  }
   0x1 LB: > { %s843_s25 = sadd.s32 4294967295, %s955_s24   ;;  %p847_p0 = scmp.ge.s32.totalorder %s955_s24, 1  ;;  %s955_s24 = sphi %s998_s24, %s18_s24  }
   0x2   : > { %p262_p1 = scmp.lt.s32.totalorder %s955_s24, 3 }
   0x4   : > { %p263_p2 = pnand %p847_p0, %p262_p1 }
   0x5   : > { %p314_p3 = scmp.lt.s32.totalorder (!%p263_p2), %s843_s25, 1 }
   0x6   : > { %266 = sbr.rel (%p263_p2) target bundleno = 251 (0xfb), region = 40 }
   0xb   : > { %vm407_vm0 = vcmask 523264   ;;  %v943_v0 = vld [vmem:[%s1160_s3 + $0x10] sm:$0xff]   ;;  %v957_v1 = vmov 0   ;;  %s1166_s25 = smov (!%p314_p3, %s843_s25), 1  ;;  %v373_v40 = vld [vmem:[%s1161_s4] sm:$0xff]  ;;  %v376_v43 = vld [vmem:[%s1161_s4 + $0x18] sm:$0xff] }
   0xc   : > { %446 = vmatprep.mubr.bf16.mxu0 %v957_v1  ;;  %942 = vset.pattern.permute.xlu1 %v957_v1  ;;  %s890_s28 = sshll.u32 %s1166_s25, 7  ;;  %s1017_s29 = sshll.u32 %s1166_s25, 6  ;;  %v375_v39 = vld [vmem:[%s1161_s4 + $0x10] sm:$0xff]  ;;  %v944_v46 = vld [vmem:[%s1160_s3] sm:$0xff]   ;;  %v374_v47 = vld [vmem:[%s1161_s4 + $0x8] sm:$0xff]  ;;  %vm693_vm1 = vcmask 130048  }
   0xd   : > { %916 = vmatprep.mubr.msk.bf16.mxu1 %vm407_vm0, %v943_v0  ;;  %941 = vset.pattern.permute.xlu0 %v957_v1  ;;  %s1022_s9 = scalar_lea.vmem %s1157_s0, %s890_s28  ;;  %s1028_s12 = scalar_lea.vmem %s1158_s1, %s1017_s29  ;;  %v945_v48 = vld [vmem:[%s1160_s3 + $0x18] sm:$0xff]   ;;  %v869_v52 = vld [vmem:[%s1161_s4 + $0x28] sm:$0xff]  ;;  %v868_v53 = vld [vmem:[%s1161_s4 + $0x20] sm:$0xff] }
   0xe   : > { %v358_v2 = vld [vmem:[%s1022_s9 + $0x68] sm:$0xff]  ;;  %v360_v3 = vld [vmem:[%s1022_s9 + $0x78] sm:$0xff]  ;;  %v481_v4 = vld [vmem:[%s1028_s12 + $0x30] sm:$0xff]  ;;  %s1056_s15 = scalar_lea.vmem %s1159_s2, %s1017_s29  ;;  %389 = vperm.xlu1 %942, %v375_v39   ;;  %379 = vperm.xlu0 %941, %v373_v40   ;;  %s894_s10 = sshll.u32 %s1166_s25, 5 }
   0xf   : > { %v368_v5 = vpack.c.bf16 %v360_v3, %v358_v2  ;;  %v482_v6 = vld [vmem:[%s1028_s12 + $0x38] sm:$0xff]  ;;  %v357_v7 = vld [vmem:[%s1022_s9 + $0x60] sm:$0xff]  ;;  %v359_v8 = vld [vmem:[%s1022_s9 + $0x70] sm:$0xff]  ;;  %s1130_s13 = scalar_lea.vmem %s1162_s5, %s1017_s29  ;;  %s338_s17 = scalar_lea.vmem %s1163_s6, %s894_s10 }
  0x10   : > { %v486_v9 = vpack.c.bf16 %v482_v6, %v481_v4  ;;  %v367_v10 = vpack.c.bf16 %v359_v8, %v357_v7  ;;  %v354_v11 = vld [vmem:[%s1022_s9 + $0x48] sm:$0xff]  ;;  %v356_v12 = vld [vmem:[%s1022_s9 + $0x58] sm:$0xff]  ;;  %v479_v13 = vld [vmem:[%s1028_s12 + $0x20] sm:$0xff]  ;;  %s343_s19 = scalar_lea.vmem %s1164_s7, %s894_s10 }
  0x11   : > { %422 = vmatprep.subr.bf16.mxu0 %v368_v5  ;;  %v366_v14 = vpack.c.bf16 %v356_v12, %v354_v11  ;;  %v480_v15 = vld [vmem:[%s1028_s12 + $0x28] sm:$0xff]  ;;  %v353_v16 = vld [vmem:[%s1022_s9 + $0x40] sm:$0xff]  ;;  %v355_v17 = vld [vmem:[%s1022_s9 + $0x50] sm:$0xff] }
  0x12   : > { %908 = vmatprep.subr.bf16.mxu1 %v486_v9  ;;  %423 = vmatpush1.bf16.msra.mxu0 %v367_v10  ;;  %v485_v18 = vpack.c.bf16 %v480_v15, %v479_v13  ;;  %v365_v19 = vpack.c.bf16 %v355_v17, %v353_v16  ;;  %v350_v20 = vld [vmem:[%s1022_s9 + $0x28] sm:$0xff]  ;;  %v352_v21 = vld [vmem:[%s1022_s9 + $0x38] sm:$0xff]  ;;  %v477_v22 = vld [vmem:[%s1028_s12 + $0x10] sm:$0xff] }
  0x13   : > { %909 = vmatpush3.bf16.msra.mxu1 %v486_v9  ;;  %424 = vmatprep.subr.bf16.mxu0 %v366_v14  ;;  %v364_v23 = vpack.c.bf16 %v352_v21, %v350_v20  ;;  %v478_v24 = vld [vmem:[%s1028_s12 + $0x18] sm:$0xff]  ;;  %v349_v25 = vld [vmem:[%s1022_s9 + $0x20] sm:$0xff]  ;;  %v351_v26 = vld [vmem:[%s1022_s9 + $0x30] sm:$0xff] }
  0x14   : > { %910 = vmatprep.subr.bf16.mxu1 %v485_v18  ;;  %v484_v27 = vpack.c.bf16 %v478_v24, %v477_v22  ;;  %v346_v28 = vld [vmem:[%s1022_s9 + $0x8] sm:$0xff]  ;;  %v348_v29 = vld [vmem:[%s1022_s9 + $0x18] sm:$0xff]  ;;  %v475_v30 = vld [vmem:[%s1028_s12] sm:$0xff]  ;;  %v363_v32 = vpack.c.bf16 %v351_v26, %v349_v25  ;;  %394 = vperm.xlu1 %942, %v376_v43  }
  0x15   : > { %v476_v31 = vld [vmem:[%s1028_s12 + $0x8] sm:$0xff]  ;;  %v362_v33 = vpack.c.bf16 %v348_v29, %v346_v28  ;;  %v345_v34 = vld [vmem:[%s1022_s9] sm:$0xff]  ;;  %v347_v35 = vld [vmem:[%s1022_s9 + $0x10] sm:$0xff]  ;;  %384 = vperm.xlu0 %941, %v374_v47  }
  0x16   : > { %425 = vmatpush1.bf16.msra.mxu0 %v365_v19  ;;  %v483_v36 = vpack.c.bf16 %v476_v31, %v475_v30  ;;  %v592_v37 = vld [vmem:[%s1056_s15 + $0x30] sm:$0xff]  ;;  %v593_v38 = vld [vmem:[%s1056_s15 + $0x38] sm:$0xff]  ;;  %v361_v41 = vpack.c.bf16 %v347_v35, %v345_v34  ;;  %v590_v44 = vld [vmem:[%s1056_s15 + $0x20] sm:$0xff] }
  0x17   : > { %911 = vmatpush3.bf16.msra.mxu1 %v485_v18  ;;  %426 = vmatprep.subr.bf16.mxu0 %v364_v23  ;;  %v597_v42 = vpack.c.bf16 %v593_v38, %v592_v37  ;;  %v591_v45 = vld [vmem:[%s1056_s15 + $0x28] sm:$0xff]  ;;  %v588_v50 = vld [vmem:[%s1056_s15 + $0x10] sm:$0xff]  ;;  %v589_v51 = vld [vmem:[%s1056_s15 + $0x18] sm:$0xff] }
  0x18   : > { %912 = vmatprep.subr.bf16.mxu1 %v484_v27  ;;  %v596_v49 = vpack.c.bf16 %v591_v45, %v590_v44  ;;  %v595_v54 = vpack.c.bf16 %v589_v51, %v588_v50  ;;  %v586_v55 = vld [vmem:[%s1056_s15] sm:$0xff]  ;;  %v587_v56 = vld [vmem:[%s1056_s15 + $0x8] sm:$0xff]  ;;  %504 = vperm.xlu1 %942, %v869_v52   ;;  %v871_v58 = vld [vmem:[%s1161_s4 + $0x38] sm:$0xff] }
  0x19   : > { %499 = vperm.xlu0 %941, %v868_v53   ;;  %v946_v57 = vld [vmem:[%s1160_s3 + $0x8] sm:$0xff]   ;;  %v870_v59 = vld [vmem:[%s1161_s4 + $0x30] sm:$0xff]  ;;  %v947_v60 = vld [vmem:[%s1160_s3 + $0x20] sm:$0xff]   ;;  %v594_v61 = vpack.c.bf16 %v587_v56, %v586_v55 }
  0x1a   : > { %427 = vmatpush1.bf16.msra.mxu0 %v363_v32  ;;  %v881_v62 = vld [vmem:[%s1161_s4 + $0x48] sm:$0xff]  ;;  %v880_v63 = vld [vmem:[%s1161_s4 + $0x40] sm:$0xff]  ;;  %v882_v2 = vld [vmem:[%s1161_s4 + $0x50] sm:$0xff] }
  0x1b   : > { %913 = vmatpush3.bf16.msra.mxu1 %v484_v27  ;;  %428 = vmatprep.subr.bf16.mxu0 %v362_v33  ;;  %v948_v0 = vld [vmem:[%s1160_s3 + $0x28] sm:$0xff]  }
  0x1c   : > { %914 = vmatprep.subr.bf16.mxu1 %v483_v36  ;;  %514 = vperm.xlu1 %942, %v871_v58  }
  0x1d   : > { %509 = vperm.xlu0 %941, %v870_v59  }
  0x1e   : > { %429 = vmatpush1.bf16.msra.mxu0 %v361_v41 }
  0x1f   : > { %915 = vmatpush3.bf16.msra.mxu1 %v483_v36  ;;  %920 = vmatprep.subr.bf16.mxu0 %v597_v42 }
  0x20   : > { %615 = vperm.xlu1 %942, %v881_v62  }
  0x21   : > { %862 = vmatmul.mubr.msk.bf16.vlgmr.msra.gmra.mxu0 %vm407_vm0, %v944_v46  ;;  %610 = vperm.xlu0 %941, %v880_v63  }
  0x22   : > { %917 = vmatmul.mubr.msk.bf16.vlgmr.msra.gmra.mxu1 %vm407_vm0, %v945_v48  ;;  %921 = vmatpush3.bf16.msra.mxu0 %v597_v42 }
  0x23   : > { %922 = vmatprep.subr.bf16.mxu0 %v596_v49  ;;  %456 = vmatprep.mubr.bf16.mxu0 %v957_v1  ;;  %v883_v1 = vld [vmem:[%s1161_s4 + $0x58] sm:$0xff] }
  0x24   : > { %625 = vperm.xlu1 %942, %v883_v1  }
  0x25   : > { %620 = vperm.xlu0 %941, %v882_v2  }
  0x26   : > { %923 = vmatpush3.bf16.msra.mxu0 %v596_v49 }
  0x27   : > { %924 = vmatprep.subr.bf16.mxu0 %v595_v54 }
  0x29   : > { %863 = vmatmul.mubr.msk.bf16.gmra.mxu0 %vm407_vm0, %v946_v57 }
  0x2a   : > { %925 = vmatpush3.bf16.msra.mxu0 %v595_v54  ;;  %928 = vmatprep.mubr.msk.bf16.mxu0 %vm407_vm0, %v947_v60 }
  0x2b   : > { %926 = vmatprep.subr.bf16.mxu0 %v594_v61 }
  0x2e   : > { %927 = vmatpush3.bf16.msra.mxu0 %v594_v61 }
  0x31   : > { %929 = vmatmul.mubr.msk.bf16.vlgmr.msra.gmra.mxu0 %vm407_vm0, %v948_v0 }
  0x89   : > { %v380_v3 = vpop.permute.xlu0 %379  ;;  %v390_v4 = vpop.permute.xlu1 %389 }
  0x8f   : > { %v395_v6 = vpop.permute.xlu1 %394 }
  0x90   : > { %v385_v5 = vpop.permute.xlu0 %384 }
  0x93   : > { %v505_v8 = vpop.permute.xlu1 %504 }
  0x94   : > { %v500_v7 = vpop.permute.xlu0 %499 }
  0x97   : > { %v515_v19 = vpop.permute.xlu1 %514 }
  0x98   : > { %v510_v10 = vpop.permute.xlu0 %509 }
  0x9b   : > { %v616_v34 = vpop.permute.xlu1 %615 }
  0x9c   : > { %v611_v29 = vpop.permute.xlu0 %610 }
  0x9f   : > { %v626_v42 = vpop.permute.xlu1 %625 }
  0xa0   : > { %v621_v37 = vpop.permute.xlu0 %620 }
  0xe1   : > { %v448_v9 = vpop.f32.mrf.mxu0 }
  0xe2   : > { %v449_v11 = vadd.f32 %v448_v9, %v380_v3  ;;  %v918_v12 = vpop.f32.mrf.mxu1 }
  0xe3   : > { %v576_v13 = vadd.f32 %v918_v12, %v510_v10  ;;  %v450_v14 = vpop.f32.mrf.mxu0 }
  0xe4   : > { %467 = vst [vmem:[%s1130_s13] sm:$0xff] %v449_v11  ;;  %v451_v15 = vadd.f32 %v450_v14, %v380_v3  ;;  %v567_v16 = vpop.f32.mrf.mxu1 }
  0xe5   : > { %584 = vst.msk [vmem:[%s338_s17 + $0x10] sm:$0xff] %vm407_vm0, %v576_v13  ;;  %v568_v17 = vadd.f32 %v567_v16, %v500_v7  ;;  %v452_v18 = vpop.f32.mrf.mxu0 }
  0xe6   : > { %468 = vst [vmem:[%s1130_s13 + $0x8] sm:$0xff] %v451_v15  ;;  %v453_v20 = vadd.f32 %v452_v18, %v385_v5  ;;  %v919_v21 = vpop.f32.mrf.mxu1 }
  0xe7   : > { %582 = vst.msk [vmem:[%s338_s17] sm:$0xff] %vm407_vm0, %v568_v17  ;;  %v579_v22 = vadd.f32 %v919_v21, %v515_v19  ;;  %v454_v23 = vpop.f32.mrf.mxu0 }
  0xe8   : > { %469 = vst [vmem:[%s1130_s13 + $0x10] sm:$0xff] %v453_v20  ;;  %v455_v24 = vadd.f32 %v454_v23, %v385_v5  ;;  %v570_v25 = vpop.f32.mrf.mxu1 }
  0xe9   : > { %585 = vst.msk [vmem:[%s338_s17 + $0x18] sm:$0xff] %vm407_vm0, %v579_v22  ;;  %v571_v26 = vadd.f32 %v570_v25, %v505_v8  ;;  %v458_v27 = vpop.f32.mrf.mxu0 }
  0xea   : > { %470 = vst [vmem:[%s1130_s13 + $0x18] sm:$0xff] %v455_v24  ;;  %v459_v28 = vadd.f32 %v458_v27, %v390_v4 }
  0xeb   : > { %583 = vst.msk [vmem:[%s338_s17 + $0x8] sm:$0xff] %vm407_vm0, %v571_v26  ;;  %v460_v30 = vpop.f32.mrf.mxu0 }
  0xec   : > { %471 = vst [vmem:[%s1130_s13 + $0x20] sm:$0xff] %v459_v28  ;;  %v461_v31 = vadd.f32 %v460_v30, %v390_v4 }
  0xed   : > { %v462_v32 = vpop.f32.mrf.mxu0 }
  0xee   : > { %472 = vst [vmem:[%s1130_s13 + $0x28] sm:$0xff] %v461_v31  ;;  %v463_v33 = vadd.f32 %v462_v32, %v395_v6 }
  0xef   : > { %v464_v35 = vpop.f32.mrf.mxu0 }
  0xf0   : > { %473 = vst [vmem:[%s1130_s13 + $0x30] sm:$0xff] %v463_v33  ;;  %v465_v36 = vadd.f32 %v464_v35, %v395_v6 }
  0xf1   : > { %v930_v38 = vpop.f32.mrf.mxu0 }
  0xf2   : > { %474 = vst [vmem:[%s1130_s13 + $0x38] sm:$0xff] %v465_v36  ;;  %v687_v39 = vadd.f32 %v930_v38, %v621_v37 }
  0xf3   : > { %v678_v40 = vpop.f32.mrf.mxu0 }
  0xf4   : > { %696 = vst.msk [vmem:[%s343_s19 + $0x10] sm:$0xff] %vm693_vm1, %v687_v39  ;;  %v679_v41 = vadd.f32 %v678_v40, %v611_v29 }
  0xf5   : > { %v931_v43 = vpop.f32.mrf.mxu0 }
  0xf6   : > { %694 = vst.msk [vmem:[%s343_s19] sm:$0xff] %vm693_vm1, %v679_v41  ;;  %v690_v44 = vadd.f32 %v931_v43, %v626_v42 }
  0xf7   : > { %v681_v45 = vpop.f32.mrf.mxu0 }
  0xf8   : > { %697 = vst.msk [vmem:[%s343_s19 + $0x18] sm:$0xff] %vm693_vm1, %v690_v44  ;;  %v682_v46 = vadd.f32 %v681_v45, %v616_v34 }
  0xfa   : > { %695 = vst.msk [vmem:[%s343_s19 + $0x8] sm:$0xff] %vm693_vm1, %v682_v46 }
  0xfb PF: > { %s18_s24 = sadd.s32 1, %s955_s24  }
  0xfc   : > { %p15_p4 = scmp.ge.s32.totalorder %s18_s24, 4  }
  0xfe   :  { %17 = sbr.rel (!%p15_p4) target bundleno = 1 (0x1), region = 104 }

</bundles_post_ra>
